<compile_context>
chip_gen: v7x
topology: tpu7x:2x2x1
jax: 0.10.0
libtpu: 0.0.40
codegen_flags: <defaults>
</compile_context>

<pallas_src>
import functools

import jax
import jax.numpy as jnp
from jax.experimental import pallas as pl
from jax.experimental.pallas import tpu as pltpu


def _customed_softmax_kernel(x_ref, o_ref, *, stable):
    # Block: (N, TILE_D). Reduction over axis 0 is fully in-block, so every
    # grid step is an independent column-wise softmax (no cross-step carry).
    x = x_ref[...].astype(jnp.float32)  # keep f32 compute: v5e EUP has no bf16 path
    if stable:
        # Mathematically identical (softmax is shift-invariant); guards exp overflow.
        x = x - jnp.max(x, axis=0, keepdims=True)
    x_exp = jnp.exp(x)
    denom = jnp.sum(x_exp, axis=0, keepdims=True)          # (1, TILE_D), XLU reduce
    inv = pl.reciprocal(denom, approx=True)                # EUP slot, frees VALU
    o_ref[...] = (x_exp * inv).astype(o_ref.dtype)


def _vmem_capacity_bytes():
    try:
        return pltpu.get_tpu_info().vmem_capacity_bytes
    except Exception:
        return 64 * 1024 * 1024  # conservative default = v7x per-TC VMEM


def _pick_tile_d(n, d, itemsize):
    """Largest multiple-of-128 lane tile that fits a per-generation VMEM budget."""
    # Per lane-column cost: in + out blocks, each double-buffered, plus one
    # f32 compute copy of the block.
    bytes_per_col = n * (2 * 2 * itemsize + 4)
    budget = _vmem_capacity_bytes() // 4
    max_tile = max(128, (budget // bytes_per_col) // 128 * 128)
    # Large enough to amortize ~0.35 us per-grid-step overhead; modest enough
    # that realistic D keeps >= 2 grid steps (v7x has 2 TensorCores/chip).
    max_tile = min(max_tile, 4096)
    return d if d <= max_tile else max_tile


def customed_softmax(x, *, tile_d=None, stable=False):
    """exp(x) / exp(x).sum(0, keepdims=True), matching CustomedSoftmax.forward."""
    n, d = x.shape
    itemsize = jnp.dtype(x.dtype).itemsize

    if tile_d is None:
        tile_d = _pick_tile_d(n, d, itemsize)
    tile_d = min(tile_d, d)  # full-extent D is always a legal block dim

    grid = (pl.cdiv(d, tile_d),)  # ragged last tile handled by Pallas

    # Raise the scoped VMEM limit to cover double-buffered in/out blocks plus
    # f32 temporaries, staying well under physical VMEM (64 MiB/TC on v7x).
    block_bytes = n * tile_d * (2 * 2 * itemsize + 3 * 4)
    vmem_limit = int(min(_vmem_capacity_bytes() // 2,
                         max(32 * 1024 * 1024, 2 * block_bytes)))

    kernel = functools.partial(_customed_softmax_kernel, stable=stable)
    return pl.pallas_call(
        kernel,
        out_shape=jax.ShapeDtypeStruct((n, d), x.dtype),
        grid=grid,
        in_specs=[pl.BlockSpec((n, tile_d), lambda j: (0, j))],
        out_specs=pl.BlockSpec((n, tile_d), lambda j: (0, j)),
        compiler_params=pltpu.CompilerParams(
            dimension_semantics=("parallel",),
            vmem_limit_bytes=vmem_limit,
        ),
    )(x)


if __name__ == "__main__":
    key = jax.random.PRNGKey(0)
    # Small shape consistent with the module: reduce over dim 0 of (8, 256).
    x = jax.random.normal(key, (8, 256), dtype=jnp.float32)

    out = jax.block_until_ready(customed_softmax(x))

    # Plain-JAX reference matching the literal PyTorch module.
    x_exp = jnp.exp(x)
    ref = x_exp / jnp.sum(x_exp, axis=0, keepdims=True)
    assert out.shape == x.shape and out.dtype == x.dtype
    # approx reciprocal (EUP vrcp) -> slightly relaxed tolerance vs exact divide
    assert jnp.allclose(out, ref, atol=5e-3, rtol=5e-3), float(
        jnp.max(jnp.abs(out - ref)))

    print("KERNEL_OK")
</pallas_src>

<mosaic_0001>
module attributes {stable_mosaic.version = 11 : i64} {
  func.func @_customed_softmax_kernel(%arg0: i32, %arg1: memref<8x256xf32, #tpu.memory_space<vmem>>, %arg2: memref<8x256xf32, #tpu.memory_space<vmem>>) attributes {dimension_semantics = [#tpu.dimension_semantics<parallel>], iteration_bounds = array<i64: 1>, scalar_prefetch = 0 : i64, scratch_operands = 0 : i64, tpu.core_type = #tpu.core_type<tc>, window_params = [{transform_indices = @transform_0, window_bounds = array<i64: 8, 256>}, {transform_indices = @transform_1, window_bounds = array<i64: 8, 256>}]} {
    %c0 = arith.constant 0 : index
    %c0_0 = arith.constant 0 : index
    %0 = vector.load %arg1[%c0, %c0_0] : memref<8x256xf32, #tpu.memory_space<vmem>>, vector<8x256xf32>
    %1 = math.exp %0 : vector<8x256xf32>
    %cst = arith.constant dense<0.000000e+00> : vector<256xf32>
    %2 = vector.multi_reduction <add>, %1, %cst [0] : vector<8x256xf32> to vector<256xf32>
    %3 = vector.shape_cast %2 : vector<256xf32> to vector<1x256xf32>
    %4 = tpu.reciprocal %3 {approx = true} : vector<1x256xf32> -> vector<1x256xf32>
    %5 = vector.broadcast %4 : vector<1x256xf32> to vector<8x256xf32>
    %6 = arith.mulf %1, %5 : vector<8x256xf32>
    %c0_1 = arith.constant 0 : index
    %c0_2 = arith.constant 0 : index
    %7 = vector.load %arg2[%c0_1, %c0_2] : memref<8x256xf32, #tpu.memory_space<vmem>>, vector<8x256xf32>
    tpu.vector_store %arg2[%c0_1, %c0_2], %6 {strides = array<i32>} : memref<8x256xf32, #tpu.memory_space<vmem>>, vector<8x256xf32>,
    return
  }
  func.func @transform_0(%arg0: i32) -> (i32, i32) {
    %c0_i32 = arith.constant 0 : i32
    %c0_i32_0 = arith.constant 0 : i32
    return %c0_i32, %arg0 : i32, i32
  }
  func.func @transform_1(%arg0: i32) -> (i32, i32) {
    %c0_i32 = arith.constant 0 : i32
    %c0_i32_0 = arith.constant 0 : i32
    return %c0_i32, %arg0 : i32, i32
  }
}

</mosaic_0001>

<bundles_post_ra>
// kernel: tpu_custom_call.1
= control target key start
LH: loop header
LB: loop body
LE: loop exit
PB: predicated region body
PF: predicated region fallthrough
CT: control target
= control target key end

     0   :  { %6 = vsyncpa [#allocation3], 0  ;;  %s154_s0 = inlined_call_operand.hbm [shape: f32[8,256], index: 0, kind: input, shape index: {}]   ;;  %s155_s1 = inlined_call_operand.hbm [shape: f32[8,256], index: 1, kind: output, shape index: {}]  }
   0x1   :  { %7 = vsyncpa [#allocation4], 0  ;;  %s118_s6 = smov [#allocation2]   ;;  %s70_s10 = scalar_lea.hbm %s154_s0, 256 }
   0x2   :  { %s14_s7 = sshll.u32 %s118_s6, 4  ;;  %p71_p0 = scmp.ne.s32.totalorder %s154_s0, %s70_s10  ;;  %s15_s7 = int_to_ptr.vmem [resolvable:$true] %s14_s7 }
   0x3   :  { %p74_p1 = scmp.lt.u32.totalorder %s70_s10, %s154_s0 }
   0x5   :  { %p76_p2 = pnand %p74_p1, %p71_p0 }
   0x7   :  { %79 = shalt.err (!%p76_p2)
}
   0x8   :  { %s80_s15 = scalar_lea.vmem %s15_s7, 256  ;;  %p85_p4 = scmp.lt.s32.totalorder %s15_s7, %s15_s7 }
   0x9   :  { %p81_p3 = scmp.ne.s32.totalorder %s15_s7, %s80_s15  ;;  %p86_p5 = scmp.lt.s32.totalorder %s80_s15, %s80_s15 }
   0xb   :  { %p87_p6 = por %p86_p5, %p85_p4 }
   0xd   :  { %p88_p7 = pnand %p87_p6, %p81_p3 }
   0xf   :  { %91 = shalt.err (!%p88_p7)
}
  0x10   :  { %17 = dma.hbm_to_vmem [thread:$0]  %s154_s0, 256, %s15_s7, [#allocation3]  }
  0x11   :  { %114 = dma.done.wait [#allocation3], 256  }
  0x12   :  { %115 = vsyncadd [#allocation3], 4294967040  ;;  %v21_v0 = vld [vmem:[#allocation2] sm:$0xff]  ;;  %v22_v1 = vld [vmem:[#allocation2 + $0x8] sm:$0xff]  ;;  %s119_s0 = smov [#allocation5]  }
  0x13   :  { %v23_v2 = vmul.f32 1.442695, %v21_v0  ;;  %v25_v3 = vmul.f32 1.442695, %v22_v1  ;;  %s51_s18 = sshll.u32 %s119_s0, 4  ;;  %s52_s18 = int_to_ptr.vmem [resolvable:$true] %s51_s18 }
  0x14   :  { %s92_s19 = scalar_lea.vmem %s52_s18, 256  ;;  %p97_p9 = scmp.lt.s32.totalorder %s52_s18, %s52_s18 }
  0x15   :  { %62 = vpow2.f32 %v23_v2  ;;  %p93_p8 = scmp.ne.s32.totalorder %s52_s18, %s92_s19  ;;  %p98_p10 = scmp.lt.s32.totalorder %s92_s19, %s92_s19 }
  0x16   :  { %64 = vpow2.f32 %v25_v3 }
  0x17   :  { %p99_p11 = por %p98_p10, %p97_p9 }
  0x19   :  { %p100_p12 = pnand %p99_p11, %p93_p8 }
  0x1f   :  { %v63_v4 = vpop.eup %62 }
  0x20   :  { %v65_v5 = vpop.eup %64  ;;  %v27_v6 = vrot.slane %v63_v4, 4 }
  0x21   :  { %v33_v7 = vrot.slane %v65_v5, 4 }
  0x22   :  { %v28_v8 = vadd.f32 %v63_v4, %v27_v6 }
  0x23   :  { %v34_v9 = vadd.f32 %v65_v5, %v33_v7 }
  0x24   :  { %v29_v10 = vrot.slane %v28_v8, 2 }
  0x25   :  { %v35_v11 = vrot.slane %v34_v9, 2 }
  0x26   :  { %v30_v12 = vadd.f32 %v29_v10, %v28_v8 }
  0x27   :  { %v36_v13 = vadd.f32 %v35_v11, %v34_v9 }
  0x28   :  { %v31_v14 = vrot.slane %v30_v12, 1 }
  0x29   :  { %v37_v15 = vrot.slane %v36_v13, 1 }
  0x2a   :  { %v32_v16 = vadd.f32 %v31_v14, %v30_v12 }
  0x2b   :  { %v38_v17 = vadd.f32 %v37_v15, %v36_v13 }
  0x2c   :  { %66 = vrcp.f32 %v32_v16 }
  0x2d   :  { %68 = vrcp.f32 %v38_v17 }
  0x36   :  { %v67_v18 = vpop.eup %66 }
  0x37   :  { %v69_v19 = vpop.eup %68  ;;  %v41_v20 = vmul.f32 %v67_v18, %v63_v4 }
  0x38   :  { %v42_v21 = vmul.f32 %v69_v19, %v65_v5 }
  0x39   :  { %43 = vst [vmem:[#allocation5] sm:$0xff] %v41_v20 }
  0x3a   :  { %44 = vst [vmem:[#allocation5 + $0x8] sm:$0xff] %v42_v21 }
  0x3b   :  { %103 = shalt.err (!%p100_p12)
}
  0x3c   :  { %s104_s22 = scalar_lea.hbm %s155_s1, 256 }
  0x3d   :  { %p105_p13 = scmp.ne.s32.totalorder %s155_s1, %s104_s22  ;;  %p108_p0 = scmp.lt.u32.totalorder %s104_s22, %s155_s1 }
  0x3f   :  { %p110_p1 = pnand %p108_p0, %p105_p13 }
  0x41   :  { %113 = shalt.err (!%p110_p1)
}
  0x42   :  { %54 = dma.vmem_to_hbm [thread:$0]  %s52_s18, 256, %s155_s1, [#allocation4]  }
  0x43   :  { %116 = dma.done.wait [#allocation4], 256  }
  0x44   :  { %117 = vsyncadd [#allocation4], 4294967040 }
  0x45   :  { %58 = vsyncpa [#allocation3], 1 }
  0x46   :  { %59 = vsyncpa [#allocation4], 1 }

</bundles_post_ra>
